<compile_context>
chip_gen: v6e
topology: v6e:2x2x1
jax: 0.10.0
libtpu: 0.0.40
codegen_flags: <defaults>
</compile_context>

<pallas_src>
import functools

import jax
import jax.numpy as jnp
from jax.experimental import pallas as pl
from jax.experimental.pallas import tpu as pltpu


LANE = 128      # lane width / MXU-friendly last-dim multiple
SUBLANE = 8     # f32 sublane tile


def _round_up(v, m):
    return ((v + m - 1) // m) * m


def _batch_tile(b):
    # >= 8 (f32 sublane), <= 128 rows (MXU-friendly), adapted to the batch size.
    return max(SUBLANE, min(LANE, _round_up(b, SUBLANE)))


# ----------------------------- Pallas kernels ------------------------------

def _fused_ae_kernel(x_ref, we_ref, be_ref, wd_ref, bd_ref, z_ref, rec_ref, *,
                     compute_dtype):
    """Fused encode+decode for one batch tile.

    z   = x @ W_e + b_e                      (bf16 operands, f32 MXU accumulate)
    rec = sigmoid(z @ W_d + b_d)             (z stays on-chip; no HBM round trip)
    """
    z = jnp.dot(x_ref[...].astype(compute_dtype), we_ref[...],
                preferred_element_type=jnp.float32)
    z = z + be_ref[...]                      # [1, L] bias broadcasts over rows
    z_ref[...] = z.astype(z_ref.dtype)       # lane-dense (L = 128) store

    r = jnp.dot(z.astype(compute_dtype), wd_ref[...],
                preferred_element_type=jnp.float32)
    r = r + bd_ref[...]
    rec_ref[...] = jax.nn.sigmoid(r).astype(rec_ref.dtype)


def _linear_kernel(x_ref, w_ref, b_ref, o_ref, *, activation, compute_dtype):
    """o = activation(x @ w + b) for one batch tile (standalone encode/decode)."""
    acc = jnp.dot(x_ref[...].astype(compute_dtype), w_ref[...],
                  preferred_element_type=jnp.float32)
    acc = acc + b_ref[...]
    if activation == "sigmoid":
        acc = jax.nn.sigmoid(acc)
    o_ref[...] = acc.astype(o_ref.dtype)


# ----------------------------- kernel wrappers ------------------------------

def fused_autoencoder(x_flat, W_e, b_e, W_d, b_d):
    """Fused forward. x_flat: [B, D] f32; W_e: [D, L] bf16; b_e: [1, L] f32;
    W_d: [L, D] bf16; b_d: [1, D] f32.  Returns (z [B, L] f32, rec [B, D] f32)."""
    B, D = x_flat.shape
    L = W_e.shape[1]
    tb = _batch_tile(B)
    b_pad = _round_up(B, tb)
    if b_pad != B:
        x_flat = jnp.pad(x_flat, ((0, b_pad - B), (0, 0)))

    cost = pl.CostEstimate(
        flops=4 * b_pad * D * L,                     # two matmuls
        transcendentals=b_pad * D,                   # sigmoid
        bytes_accessed=(b_pad * D * 4                # x
                        + D * L * 2 + L * 4          # W_e (bf16) + b_e
                        + L * D * 2 + D * 4          # W_d (bf16) + b_d
                        + b_pad * L * 4              # z out
                        + b_pad * D * 4))            # reconstruction out

    kernel = functools.partial(_fused_ae_kernel, compute_dtype=W_e.dtype)
    z_pad, rec_pad = pl.pallas_call(
        kernel,
        out_shape=(jax.ShapeDtypeStruct((b_pad, L), jnp.float32),
                   jax.ShapeDtypeStruct((b_pad, D), jnp.float32)),
        grid_spec=pltpu.PrefetchScalarGridSpec(
            num_scalar_prefetch=0,
            grid=(b_pad // tb,),
            in_specs=[
                pl.BlockSpec((tb, D), lambda i: (i, 0)),   # x batch tile
                pl.BlockSpec((D, L), lambda i: (0, 0)),    # W_e, resident
                pl.BlockSpec((1, L), lambda i: (0, 0)),    # b_e
                pl.BlockSpec((L, D), lambda i: (0, 0)),    # W_d, resident
                pl.BlockSpec((1, D), lambda i: (0, 0)),    # b_d
            ],
            out_specs=[
                pl.BlockSpec((tb, L), lambda i: (i, 0)),   # z (lane-dense, 128)
                pl.BlockSpec((tb, D), lambda i: (i, 0)),   # reconstruction
            ],
        ),
        compiler_params=pltpu.CompilerParams(
            dimension_semantics=("parallel",)),            # megacore on v7x
        cost_estimate=cost,
    )(x_flat, W_e, b_e, W_d, b_d)
    return z_pad[:B], rec_pad[:B]


def dense(x, w, b, *, activation="none"):
    """Standalone Pallas dense layer. x: [B, K] f32, w: [K, N] bf16,
    b: [1, N] f32 -> [B, N] f32. Batch padded/tiled; weights resident."""
    B, K = x.shape
    K2, N = w.shape
    assert K == K2
    tb = _batch_tile(B)
    b_pad = _round_up(B, tb)
    if b_pad != B:
        x = jnp.pad(x, ((0, b_pad - B), (0, 0)))

    kernel = functools.partial(_linear_kernel, activation=activation,
                               compute_dtype=w.dtype)
    out = pl.pallas_call(
        kernel,
        out_shape=jax.ShapeDtypeStruct((b_pad, N), jnp.float32),
        grid_spec=pltpu.PrefetchScalarGridSpec(
            num_scalar_prefetch=0,
            grid=(b_pad // tb,),
            in_specs=[
                pl.BlockSpec((tb, K), lambda i: (i, 0)),
                pl.BlockSpec((K, N), lambda i: (0, 0)),
                pl.BlockSpec((1, N), lambda i: (0, 0)),
            ],
            out_specs=pl.BlockSpec((tb, N), lambda i: (i, 0)),
        ),
        compiler_params=pltpu.CompilerParams(
            dimension_semantics=("parallel",)),
        cost_estimate=pl.CostEstimate(
            flops=2 * b_pad * K * N,
            transcendentals=(b_pad * N if activation == "sigmoid" else 0),
            bytes_accessed=(b_pad * K * 4 + K * N * w.dtype.itemsize
                            + N * 4 + b_pad * N * 4)),
    )(x, w, b)
    return out[:B]


# ------------------------------- AutoEncoder -------------------------------

class AutoEncoderPallas:
    """Concrete AutoEncoder: linear encode, sigmoid-linear decode.

    Parameters are stored pre-padded to TPU-friendly shapes:
      W_e: [D, L_pad]  bf16 (latent zero-padded 32 -> 128 lanes)
      b_e: [1, L_pad]  f32  (zero-padded)
      W_d: [L_pad, D]  bf16 (zero rows for padded latent dims)
      b_d: [1, D]      f32
    The zero padding makes stores lane-dense and the decoder K a full MXU tile
    without changing the math (padded z columns are exactly zero).
    """

    def __init__(self, in_shape=(4, 16, 16), latent_dim=32, key=None,
                 param_dtype=jnp.bfloat16):
        C, H, W = in_shape
        D = C * H * W
        self.in_shape = in_shape
        self.latent_dim = latent_dim
        self.latent_pad = _round_up(max(latent_dim, LANE), LANE)
        if key is None:
            key = jax.random.PRNGKey(0)
        k1, k2, k3, k4 = jax.random.split(key, 4)
        scale_e = 1.0 / jnp.sqrt(D)
        scale_d = 1.0 / jnp.sqrt(latent_dim)
        W_e = jax.random.normal(k1, (D, latent_dim), jnp.float32) * scale_e
        b_e = jax.random.normal(k2, (latent_dim,), jnp.float32) * scale_e
        W_d = jax.random.normal(k3, (latent_dim, D), jnp.float32) * scale_d
        b_d = jax.random.normal(k4, (D,), jnp.float32) * scale_d
        pad_l = self.latent_pad - latent_dim
        self.W_e = jnp.pad(W_e, ((0, 0), (0, pad_l))).astype(param_dtype)
        self.b_e = jnp.pad(b_e, ((0, pad_l),)).reshape(1, self.latent_pad)
        self.W_d = jnp.pad(W_d, ((0, pad_l), (0, 0))).astype(param_dtype)
        self.b_d = b_d.reshape(1, D)

    # --- standalone pieces (each one Pallas dense kernel) -------------------
    def encode(self, x):
        B = x.shape[0]
        x_flat = x.reshape(B, -1).astype(jnp.float32)   # NCHW -> [B, C*H*W]
        z_pad = dense(x_flat, self.W_e, self.b_e, activation="none")
        return {"z": z_pad[:, :self.latent_dim]}

    def decode(self, z):
        B = z.shape[0]
        z_pad = jnp.pad(z.astype(jnp.float32),
                        ((0, 0), (0, self.latent_pad - z.shape[1])))
        xhat_flat = dense(z_pad, self.W_d, self.b_d, activation="sigmoid")
        C, H, W = self.in_shape
        return {"reconstruction": xhat_flat.reshape(B, C, H, W)}

    # --- fused hot path ------------------------------------------------------
    def forward(self, x):
        """Same observable semantics as the PyTorch base class forward()
        (encode -> take 'z' -> decode -> merge dicts), with encode+decode fused
        into a single pallas_call so z never leaves the chip."""
        B = x.shape[0]
        C, H, W = self.in_shape
        x_flat = x.reshape(B, -1).astype(jnp.float32)
        z_pad, rec_flat = fused_autoencoder(x_flat, self.W_e, self.b_e,
                                            self.W_d, self.b_d)
        return {"z": z_pad[:, :self.latent_dim],
                "reconstruction": rec_flat.reshape(B, C, H, W)}


# ---------------------------------- main -----------------------------------

if __name__ == "__main__":
    key = jax.random.PRNGKey(0)
    k_x, k_p = jax.random.split(key)

    B, C, H, W = 2, 4, 16, 16           # small NCHW input
    x = jax.random.normal(k_x, (B, C, H, W), jnp.float32)

    model = AutoEncoderPallas(in_shape=(C, H, W), latent_dim=32, key=k_p)
    out = model.forward(x)

    jax.block_until_ready(out["z"])
    jax.block_until_ready(out["reconstruction"])

    assert out["z"].shape == (B, 32)
    assert out["reconstruction"].shape == (B, C, H, W)

    # Pure-JAX reference following the same bf16-weight / f32-accumulate path.
    x_flat = x.reshape(B, -1)
    W_e_f32 = model.W_e.astype(jnp.float32)            # [D, 128]
    W_d_f32 = model.W_d.astype(jnp.float32)            # [128, D]
    xb = x_flat.astype(jnp.bfloat16).astype(jnp.float32)
    z_ref_pad = xb @ W_e_f32 + model.b_e               # [B, 128]
    z_ref = z_ref_pad[:, :model.latent_dim]
    zb = z_ref_pad.astype(jnp.bfloat16).astype(jnp.float32)
    rec_ref = jax.nn.sigmoid(zb @ W_d_f32 + model.b_d).reshape(B, C, H, W)

    assert jnp.allclose(out["z"], z_ref, atol=1e-3, rtol=1e-3)
    assert jnp.allclose(out["reconstruction"], rec_ref, atol=2e-3, rtol=2e-3)

    # Consistency: fused forward() == base-class encode -> decode -> merge.
    enc = model.encode(x)
    dec = model.decode(enc["z"])
    assert jnp.allclose(out["z"], enc["z"], atol=1e-3, rtol=1e-3)
    assert jnp.allclose(out["reconstruction"], dec["reconstruction"],
                        atol=2e-3, rtol=2e-3)

    print("KERNEL_OK")
</pallas_src>

<mosaic_0001>
module attributes {stable_mosaic.version = 11 : i64} {
  func.func @_fused_ae_kernel(%arg0: i32, %arg1: memref<8x1024xf32, #tpu.memory_space<vmem>>, %arg2: memref<1024x128xbf16, #tpu.memory_space<vmem>>, %arg3: memref<1x128xf32, #tpu.memory_space<vmem>>, %arg4: memref<128x1024xbf16, #tpu.memory_space<vmem>>, %arg5: memref<1x1024xf32, #tpu.memory_space<vmem>>, %arg6: memref<8x128xf32, #tpu.memory_space<vmem>>, %arg7: memref<8x1024xf32, #tpu.memory_space<vmem>>) attributes {dimension_semantics = [#tpu.dimension_semantics<parallel>], iteration_bounds = array<i64: 1>, scalar_prefetch = 0 : i64, scratch_operands = 0 : i64, tpu.core_type = #tpu.core_type<tc>, window_params = [{transform_indices = @transform_0, window_bounds = array<i64: 8, 1024>}, {pipeline_mode = #tpu.pipeline_mode<synchronous>, transform_indices = @transform_1, window_bounds = array<i64: 1024, 128>}, {pipeline_mode = #tpu.pipeline_mode<synchronous>, transform_indices = @transform_2, window_bounds = array<i64: 1, 128>}, {pipeline_mode = #tpu.pipeline_mode<synchronous>, transform_indices = @transform_3, window_bounds = array<i64: 128, 1024>}, {pipeline_mode = #tpu.pipeline_mode<synchronous>, transform_indices = @transform_4, window_bounds = array<i64: 1, 1024>}, {transform_indices = @transform_5, window_bounds = array<i64: 8, 128>}, {transform_indices = @transform_6, window_bounds = array<i64: 8, 1024>}]} {
    %c0 = arith.constant 0 : index
    %c0_0 = arith.constant 0 : index
    %0 = vector.load %arg1[%c0, %c0_0] : memref<8x1024xf32, #tpu.memory_space<vmem>>, vector<8x1024xf32>
    %1 = arith.truncf %0 : vector<8x1024xf32> to vector<8x1024xbf16>
    %c0_1 = arith.constant 0 : index
    %c0_2 = arith.constant 0 : index
    %2 = vector.load %arg2[%c0_1, %c0_2] : memref<1024x128xbf16, #tpu.memory_space<vmem>>, vector<1024x128xbf16>
    %cst = arith.constant dense<0.000000e+00> : vector<8x128xf32>
    %3 = tpu.matmul %1, %2, %cst {dimension_numbers = #tpu.dot_dimension_numbers<[1], [0], [0], [1], [0, 0, 1, 1], [], []>} : vector<8x1024xbf16>, vector<1024x128xbf16>, vector<8x128xf32> -> vector<8x128xf32>
    %c0_3 = arith.constant 0 : index
    %c0_4 = arith.constant 0 : index
    %4 = vector.load %arg3[%c0_3, %c0_4] : memref<1x128xf32, #tpu.memory_space<vmem>>, vector<1x128xf32>
    %5 = vector.broadcast %4 : vector<1x128xf32> to vector<8x128xf32>
    %6 = arith.addf %3, %5 : vector<8x128xf32>
    %c0_5 = arith.constant 0 : index
    %c0_6 = arith.constant 0 : index
    %7 = vector.load %arg6[%c0_5, %c0_6] : memref<8x128xf32, #tpu.memory_space<vmem>>, vector<8x128xf32>
    tpu.vector_store %arg6[%c0_5, %c0_6], %6 {strides = array<i32>} : memref<8x128xf32, #tpu.memory_space<vmem>>, vector<8x128xf32>,
    %8 = arith.truncf %6 : vector<8x128xf32> to vector<8x128xbf16>
    %c0_7 = arith.constant 0 : index
    %c0_8 = arith.constant 0 : index
    %9 = vector.load %arg4[%c0_7, %c0_8] : memref<128x1024xbf16, #tpu.memory_space<vmem>>, vector<128x1024xbf16>
    %cst_9 = arith.constant dense<0.000000e+00> : vector<8x1024xf32>
    %10 = tpu.matmul %8, %9, %cst_9 {dimension_numbers = #tpu.dot_dimension_numbers<[1], [0], [0], [1], [0, 0, 1, 1], [], []>} : vector<8x128xbf16>, vector<128x1024xbf16>, vector<8x1024xf32> -> vector<8x1024xf32>
    %c0_10 = arith.constant 0 : index
    %c0_11 = arith.constant 0 : index
    %11 = vector.load %arg5[%c0_10, %c0_11] : memref<1x1024xf32, #tpu.memory_space<vmem>>, vector<1x1024xf32>
    %12 = vector.broadcast %11 : vector<1x1024xf32> to vector<8x1024xf32>
    %13 = arith.addf %10, %12 : vector<8x1024xf32>
    %14 = arith.negf %13 : vector<8x1024xf32>
    %15 = math.exp %14 : vector<8x1024xf32>
    %cst_12 = arith.constant 1.000000e+00 : f32
    %16 = vector.broadcast %cst_12 : f32 to vector<8x1024xf32>
    %17 = arith.addf %16, %15 : vector<8x1024xf32>
    %18 = arith.divf %16, %17 : vector<8x1024xf32>
    %c0_13 = arith.constant 0 : index
    %c0_14 = arith.constant 0 : index
    %19 = vector.load %arg7[%c0_13, %c0_14] : memref<8x1024xf32, #tpu.memory_space<vmem>>, vector<8x1024xf32>
    tpu.vector_store %arg7[%c0_13, %c0_14], %18 {strides = array<i32>} : memref<8x1024xf32, #tpu.memory_space<vmem>>, vector<8x1024xf32>,
    return
  }
  func.func @transform_0(%arg0: i32) -> (i32, i32) {
    %c0_i32 = arith.constant 0 : i32
    %c0_i32_0 = arith.constant 0 : i32
    return %arg0, %c0_i32 : i32, i32
  }
  func.func @transform_1(%arg0: i32) -> (i32, i32) {
    %c0_i32 = arith.constant 0 : i32
    %c0_i32_0 = arith.constant 0 : i32
    %c0_i32_1 = arith.constant 0 : i32
    return %c0_i32, %c0_i32_0 : i32, i32
  }
  func.func @transform_2(%arg0: i32) -> (i32, i32) {
    %c0_i32 = arith.constant 0 : i32
    %c0_i32_0 = arith.constant 0 : i32
    %c0_i32_1 = arith.constant 0 : i32
    return %c0_i32, %c0_i32_0 : i32, i32
  }
  func.func @transform_3(%arg0: i32) -> (i32, i32) {
    %c0_i32 = arith.constant 0 : i32
    %c0_i32_0 = arith.constant 0 : i32
    %c0_i32_1 = arith.constant 0 : i32
    return %c0_i32, %c0_i32_0 : i32, i32
  }
  func.func @transform_4(%arg0: i32) -> (i32, i32) {
    %c0_i32 = arith.constant 0 : i32
    %c0_i32_0 = arith.constant 0 : i32
    %c0_i32_1 = arith.constant 0 : i32
    return %c0_i32, %c0_i32_0 : i32, i32
  }
  func.func @transform_5(%arg0: i32) -> (i32, i32) {
    %c0_i32 = arith.constant 0 : i32
    %c0_i32_0 = arith.constant 0 : i32
    return %arg0, %c0_i32 : i32, i32
  }
  func.func @transform_6(%arg0: i32) -> (i32, i32) {
    %c0_i32 = arith.constant 0 : i32
    %c0_i32_0 = arith.constant 0 : i32
    return %arg0, %c0_i32 : i32, i32
  }
}

</mosaic_0001>

<bundles_post_ra>
// kernel: tpu_custom_call.1
= control target key start
LH: loop header
LB: loop body
LE: loop exit
PB: predicated region body
PF: predicated region fallthrough
CT: control target
= control target key end

     0   :  { %12 = vsyncpa [#allocation3], 0  ;;  %s1985_s0 = inlined_call_operand.hbm [shape: f32[8,1024], index: 0, kind: input, shape index: {}]   ;;  %s1986_s1 = inlined_call_operand.hbm [shape: bf16[1024,128], index: 1, kind: input, shape index: {}]   ;;  %s1987_s2 = inlined_call_operand.vmem [shape: f32[1,128], index: 2, kind: input, shape index: {}]   ;;  %s1988_s3 = inlined_call_operand.hbm [shape: bf16[128,1024], index: 3, kind: input, shape index: {}]   ;;  %s1989_s4 = inlined_call_operand.hbm [shape: f32[1,1024], index: 4, kind: input, shape index: {}]   ;;  %s1990_s5 = inlined_call_operand.hbm [shape: f32[8,128], index: 5, kind: output, shape index: {0}]   ;;  %s1991_s6 = inlined_call_operand.hbm [shape: f32[8,1024], index: 6, kind: output, shape index: {1}]  }
   0x1   :  { %13 = vsyncpa [#allocation6], 0 }
   0x2   :  { %14 = vsyncpa [#allocation9], 0 }
   0x3   :  { %15 = vsyncpa [#allocation4], 0 }
   0x4   :  { %16 = vsyncpa [#allocation12], 0  ;;  %s1912_s21 = smov [#allocation5]  }
   0x5   :  { %s32_s22 = sshll.u32 %s1912_s21, 4  ;;  %s33_s22 = int_to_ptr.vmem [resolvable:$true] %s32_s22 }
   0x6   :  { %s1790_s23 = scalar_lea.vmem %s33_s22, 8192  ;;  %p1795_p1 = scmp.lt.s32.totalorder %s33_s22, %s33_s22 }
   0x7   :  { %p1791_p0 = scmp.ne.s32.totalorder %s33_s22, %s1790_s23  ;;  %p1796_p2 = scmp.lt.s32.totalorder %s1790_s23, %s1790_s23 }
   0x9   :  { %p1797_p3 = por %p1796_p2, %p1795_p1 }
   0xb   :  { %p1798_p4 = pnand %p1797_p3, %p1791_p0 }
   0xd   :  { %1801 = shalt.err (!%p1798_p4)
}
   0xe   :  { %s1913_s24 = smov 64   ;;  %s1914_s25 = smov 4  }
   0xf   :  { %38 = dma.hbm_to_vmem [thread:$0]  %s1986_s1, 8192, %s33_s22, [#allocation6], %s1913_s24, %s1913_s24, %s1914_s25  }
  0x10   :  { %s1915_s28 = smov [#allocation2]   ;;  %s1916_s30 = smov [#allocation7]  }
  0x11   :  { %s23_s29 = sshll.u32 %s1915_s28, 4  ;;  %s46_s7 = sshll.u32 %s1916_s30, 4  ;;  %s24_s29 = int_to_ptr.vmem [resolvable:$true] %s23_s29  ;;  %s47_s7 = int_to_ptr.vmem [resolvable:$true] %s46_s7 }
  0x12   :  { %s1810_s8 = scalar_lea.vmem %s24_s29, 1024  ;;  %p1815_p6 = scmp.lt.s32.totalorder %s24_s29, %s24_s29 }
  0x13   :  { %p1811_p5 = scmp.ne.s32.totalorder %s24_s29, %s1810_s8  ;;  %p1816_p7 = scmp.lt.s32.totalorder %s1810_s8, %s1810_s8 }
  0x15   :  { %p1817_p8 = por %p1816_p7, %p1815_p6 }
  0x17   :  { %p1818_p9 = pnand %p1817_p8, %p1811_p5 }
  0x19   :  { %1821 = shalt.err (!%p1818_p9)
}
  0x1a   :  { %26 = dma.hbm_to_vmem [thread:$0]  %s1985_s0, 1024, %s24_s29, [#allocation3]  }
  0x1b   :  { %s1830_s11 = scalar_lea.vmem %s47_s7, 8192  ;;  %p1835_p11 = scmp.lt.s32.totalorder %s47_s7, %s47_s7 }
  0x1c   :  { %p1831_p10 = scmp.ne.s32.totalorder %s47_s7, %s1830_s11  ;;  %p1836_p12 = scmp.lt.s32.totalorder %s1830_s11, %s1830_s11 }
  0x1e   :  { %p1837_p13 = por %p1836_p12, %p1835_p11 }
  0x20   :  { %p1838_p0 = pnand %p1837_p13, %p1831_p10 }
  0x22   :  { %1841 = shalt.err (!%p1838_p0)
}
  0x23   :  { %s1917_s1 = smov 512   ;;  %s1918_s12 = smov 32  }
  0x24   :  { %52 = dma.hbm_to_vmem [thread:$0]  %s1988_s3, 8192, %s47_s7, [#allocation6], %s1917_s1, %s1917_s1, %s1918_s12  }
  0x25   :  { %s1919_s15 = smov [#allocation8]  }
  0x26   :  { %s59_s16 = sshll.u32 %s1919_s15, 4  ;;  %s60_s16 = int_to_ptr.vmem [resolvable:$true] %s59_s16 }
  0x27   :  { %s1850_s17 = scalar_lea.vmem %s60_s16, 128  ;;  %p1855_p2 = scmp.lt.s32.totalorder %s60_s16, %s60_s16 }
  0x28   :  { %p1851_p1 = scmp.ne.s32.totalorder %s60_s16, %s1850_s17  ;;  %p1856_p3 = scmp.lt.s32.totalorder %s1850_s17, %s1850_s17 }
  0x2a   :  { %p1857_p4 = por %p1856_p3, %p1855_p2 }
  0x2c   :  { %p1858_p5 = pnand %p1857_p4, %p1851_p1 }
  0x2e   :  { %1861 = shalt.err (!%p1858_p5)
}
  0x2f   :  { %62 = dma.hbm_to_vmem [thread:$0]  %s1989_s4, 128, %s60_s16, [#allocation9]  }
  0x30   :  { %1902 = dma.done.wait [#allocation3], 1024  }
  0x31   :  { %1903 = vsyncadd [#allocation3], 4294966272 }
  0x32   :  { %1904 = dma.done.wait [#allocation6], 16384  }
  0x33   :  { %1905 = vsyncadd [#allocation6], 4294950912 }
  0x34   :  { %1906 = dma.done.wait [#allocation9], 128  }
  0x35   :  { %1907 = vsyncadd [#allocation9], 4294967168  ;;  %v1686_v0 = vld [vmem:[#allocation5 + $0x78] sm:$0xff]   ;;  %v1690_v4 = vld [vmem:[#allocation5 + $0x70] sm:$0xff]  }
  0x36   :  { %v1687_v1 = vld [vmem:[#allocation5 + $0xf8] sm:$0xff]   ;;  %1587 = vmatprep.subr.bf16.mxu0 %v1686_v0  ;;  %v1691_v5 = vld [vmem:[#allocation5 + $0xf0] sm:$0xff]   ;;  %v1694_v8 = vld [vmem:[#allocation5 + $0x68] sm:$0xff]  }
  0x37   :  { %v1688_v2 = vld [vmem:[#allocation5 + $0x38] sm:$0xff]   ;;  %1609 = vmatprep.subr.bf16.mxu1 %v1687_v1  ;;  %v1692_v6 = vld [vmem:[#allocation5 + $0x30] sm:$0xff]   ;;  %v1695_v9 = vld [vmem:[#allocation5 + $0xe8] sm:$0xff]  }
  0x38   :  { %v1689_v3 = vld [vmem:[#allocation5 + $0xb8] sm:$0xff]   ;;  %1588 = vmatpush3.bf16.msra.mxu0 %v1688_v2  ;;  %v1693_v7 = vld [vmem:[#allocation5 + $0xb0] sm:$0xff]   ;;  %v1696_v10 = vld [vmem:[#allocation5 + $0x28] sm:$0xff]  }
  0x39   :  { %1610 = vmatpush3.bf16.msra.mxu1 %v1689_v3  ;;  %1589 = vmatprep.subr.bf16.mxu0 %v1690_v4  ;;  %v1697_v11 = vld [vmem:[#allocation5 + $0xa8] sm:$0xff]   ;;  %v1698_v12 = vld [vmem:[#allocation5 + $0x60] sm:$0xff]   ;;  %v1702_v16 = vld [vmem:[#allocation5 + $0x58] sm:$0xff]  }
  0x3a   :  { %1611 = vmatprep.subr.bf16.mxu1 %v1691_v5  ;;  %v1699_v13 = vld [vmem:[#allocation5 + $0xe0] sm:$0xff]   ;;  %v1703_v17 = vld [vmem:[#allocation5 + $0xd8] sm:$0xff]   ;;  %v1706_v20 = vld [vmem:[#allocation5 + $0x50] sm:$0xff]  }
  0x3b   :  { %v1700_v14 = vld [vmem:[#allocation5 + $0x20] sm:$0xff]   ;;  %v1704_v18 = vld [vmem:[#allocation5 + $0x18] sm:$0xff]   ;;  %v1707_v21 = vld [vmem:[#allocation5 + $0xd0] sm:$0xff]  }
  0x3c   :  { %1590 = vmatpush3.bf16.msra.mxu0 %v1692_v6  ;;  %v1701_v15 = vld [vmem:[#allocation5 + $0xa0] sm:$0xff]   ;;  %v1705_v19 = vld [vmem:[#allocation5 + $0x98] sm:$0xff]   ;;  %v1708_v22 = vld [vmem:[#allocation5 + $0x10] sm:$0xff]  }
  0x3d   :  { %1612 = vmatpush3.bf16.msra.mxu1 %v1693_v7  ;;  %1591 = vmatprep.subr.bf16.mxu0 %v1694_v8  ;;  %v1709_v23 = vld [vmem:[#allocation5 + $0x90] sm:$0xff]   ;;  %v1710_v24 = vld [vmem:[#allocation5 + $0x48] sm:$0xff]   ;;  %v1714_v28 = vld [vmem:[#allocation5 + $0x40] sm:$0xff]  }
  0x3e   :  { %1613 = vmatprep.subr.bf16.mxu1 %v1695_v9  ;;  %v1711_v25 = vld [vmem:[#allocation5 + $0xc8] sm:$0xff]   ;;  %v1715_v29 = vld [vmem:[#allocation5 + $0xc0] sm:$0xff]   ;;  %v79_v33 = vld [vmem:[#allocation2 + $0x18] sm:$0xff] }
  0x3f   :  { %v1712_v26 = vld [vmem:[#allocation5 + $0x8] sm:$0xff]   ;;  %v1716_v30 = vld [vmem:[#allocation5] sm:$0xff]   ;;  %v87_v36 = vpack.c.bf16 %v79_v33, %v79_v33  ;;  %v78_v38 = vld [vmem:[#allocation2 + $0x10] sm:$0xff] }
  0x40   :  { %1592 = vmatpush3.bf16.msra.mxu0 %v1696_v10  ;;  %v1713_v27 = vld [vmem:[#allocation5 + $0x88] sm:$0xff]   ;;  %v1717_v31 = vld [vmem:[#allocation5 + $0x80] sm:$0xff]   ;;  %v86_v39 = vpack.c.bf16 %v78_v38, %v78_v38  ;;  %v1718_v40 = vld [vmem:[#allocation5 + $0x178] sm:$0xff]  }
  0x41   :  { %1614 = vmatpush3.bf16.msra.mxu1 %v1697_v11  ;;  %1593 = vmatprep.subr.bf16.mxu0 %v1698_v12  ;;  %v77_v32 = vld [vmem:[#allocation2 + $0x8] sm:$0xff]  ;;  %v76_v34 = vld [vmem:[#allocation2] sm:$0xff]  ;;  %v1719_v41 = vld [vmem:[#allocation5 + $0x1f8] sm:$0xff]  }
  0x42   :  { %1615 = vmatprep.subr.bf16.mxu1 %v1699_v13  ;;  %v85_v35 = vpack.c.bf16 %v77_v32, %v77_v32  ;;  %v84_v37 = vpack.c.bf16 %v76_v34, %v76_v34  ;;  %683 = vmatprep.mubr.bf16.mxu1 %v87_v36  ;;  %v1720_v42 = vld [vmem:[#allocation5 + $0x138] sm:$0xff]   ;;  %v1722_v44 = vld [vmem:[#allocation5 + $0x170] sm:$0xff]   ;;  %v1726_v48 = vld [vmem:[#allocation5 + $0x168] sm:$0xff]  }
  0x43   :  { %v1721_v43 = vld [vmem:[#allocation5 + $0x1b8] sm:$0xff]   ;;  %v1723_v45 = vld [vmem:[#allocation5 + $0x1f0] sm:$0xff]   ;;  %v1727_v49 = vld [vmem:[#allocation5 + $0x1e8] sm:$0xff]  }
  0x44   :  { %1594 = vmatpush3.bf16.msra.mxu0 %v1700_v14  ;;  %643 = vmatprep.mubr.bf16.mxu0 %v85_v35  ;;  %v1724_v46 = vld [vmem:[#allocation5 + $0x130] sm:$0xff]   ;;  %v1728_v50 = vld [vmem:[#allocation5 + $0x128] sm:$0xff]   ;;  %v1730_v52 = vld [vmem:[#allocation5 + $0x160] sm:$0xff]  }
  0x45   :  { %1616 = vmatpush3.bf16.msra.mxu1 %v1701_v15  ;;  %1595 = vmatprep.subr.bf16.mxu0 %v1702_v16  ;;  %v1725_v47 = vld [vmem:[#allocation5 + $0x1b0] sm:$0xff]   ;;  %v1729_v51 = vld [vmem:[#allocation5 + $0x1a8] sm:$0xff]   ;;  %v1731_v53 = vld [vmem:[#allocation5 + $0x1e0] sm:$0xff]  }
  0x46   :  { %1617 = vmatprep.subr.bf16.mxu1 %v1703_v17  ;;  %v1732_v54 = vld [vmem:[#allocation5 + $0x120] sm:$0xff]   ;;  %v1734_v56 = vld [vmem:[#allocation5 + $0x158] sm:$0xff]   ;;  %v1738_v60 = vld [vmem:[#allocation5 + $0x150] sm:$0xff]  }
  0x47   :  { %v1733_v55 = vld [vmem:[#allocation5 + $0x1a0] sm:$0xff]   ;;  %v1735_v57 = vld [vmem:[#allocation5 + $0x1d8] sm:$0xff]   ;;  %v1739_v61 = vld [vmem:[#allocation5 + $0x1d0] sm:$0xff]  }
  0x48   :  { %1596 = vmatpush3.bf16.msra.mxu0 %v1704_v18  ;;  %v1736_v58 = vld [vmem:[#allocation5 + $0x118] sm:$0xff]   ;;  %v1740_v62 = vld [vmem:[#allocation5 + $0x110] sm:$0xff]   ;;  %v1742_v0 = vld [vmem:[#allocation5 + $0x148] sm:$0xff]  }
  0x49   :  { %1618 = vmatpush3.bf16.msra.mxu1 %v1705_v19  ;;  %1597 = vmatprep.subr.bf16.mxu0 %v1706_v20  ;;  %v1737_v59 = vld [vmem:[#allocation5 + $0x198] sm:$0xff]   ;;  %v1741_v63 = vld [vmem:[#allocation5 + $0x190] sm:$0xff]   ;;  %v1743_v1 = vld [vmem:[#allocation5 + $0x1c8] sm:$0xff]  }
  0x4a   :  { %1619 = vmatprep.subr.bf16.mxu1 %v1707_v21  ;;  %v1744_v2 = vld [vmem:[#allocation5 + $0x108] sm:$0xff]   ;;  %v1746_v4 = vld [vmem:[#allocation5 + $0x140] sm:$0xff]   ;;  %v83_v9 = vld [vmem:[#allocation2 + $0x38] sm:$0xff] }
  0x4b   :  { %v1745_v3 = vld [vmem:[#allocation5 + $0x188] sm:$0xff]   ;;  %v1747_v5 = vld [vmem:[#allocation5 + $0x1c0] sm:$0xff]   ;;  %v91_v11 = vpack.c.bf16 %v83_v9, %v83_v9  ;;  %v82_v13 = vld [vmem:[#allocation2 + $0x30] sm:$0xff] }
  0x4c   :  { %1598 = vmatpush3.bf16.msra.mxu0 %v1708_v22  ;;  %v1748_v6 = vld [vmem:[#allocation5 + $0x100] sm:$0xff]   ;;  %v81_v8 = vld [vmem:[#allocation2 + $0x28] sm:$0xff]  ;;  %v90_v15 = vpack.c.bf16 %v82_v13, %v82_v13 }
  0x4d   :  { %1620 = vmatpush3.bf16.msra.mxu1 %v1709_v23  ;;  %1599 = vmatprep.subr.bf16.mxu0 %v1710_v24  ;;  %v1749_v7 = vld [vmem:[#allocation5 + $0x180] sm:$0xff]   ;;  %v89_v10 = vpack.c.bf16 %v81_v8, %v81_v8  ;;  %v830_v18 = vld [vmem:[#allocation7 + $0x1c8] sm:$0xff] }
  0x4e   :  { %1621 = vmatprep.subr.bf16.mxu1 %v1711_v25  ;;  %v80_v12 = vld [vmem:[#allocation2 + $0x20] sm:$0xff]  ;;  %v834_v21 = vld [vmem:[#allocation7 + $0x1e8] sm:$0xff] }
  0x4f   :  { %v88_v14 = vpack.c.bf16 %v80_v12, %v80_v12  ;;  %v829_v16 = vld [vmem:[#allocation7 + $0x1c0] sm:$0xff]  ;;  %v1573_v24 = vcombine.low %v830_v18, %v834_v21  ;;  %v1574_v25 = vcombine.high %v830_v18, %v834_v21  ;;  %v814_v32 = vld [vmem:[#allocation7 + $0x148] sm:$0xff]  ;;  %v832_v18 = vld [vmem:[#allocation7 + $0x1d8] sm:$0xff] }
  0x50   :  { %1600 = vmatpush3.bf16.msra.mxu0 %v1712_v26  ;;  %v833_v17 = vld [vmem:[#allocation7 + $0x1e0] sm:$0xff]  ;;  %v818_v33 = vld [vmem:[#allocation7 + $0x168] sm:$0xff]  ;;  %v836_v21 = vld [vmem:[#allocation7 + $0x1f8] sm:$0xff] }
  0x51   :  { %1622 = vmatpush3.bf16.msra.mxu1 %v1713_v27  ;;  %1601 = vmatprep.subr.bf16.mxu0 %v1714_v28  ;;  %v1571_v19 = vcombine.low %v829_v16, %v833_v17  ;;  %v1572_v20 = vcombine.high %v829_v16, %v833_v17  ;;  %v821_v22 = vld [vmem:[#allocation7 + $0x180] sm:$0xff]  ;;  %v822_v27 = vld [vmem:[#allocation7 + $0x188] sm:$0xff]  ;;  %v831_v16 = vld [vmem:[#allocation7 + $0x1d0] sm:$0xff] }
  0x52   :  { %1623 = vmatprep.subr.bf16.mxu1 %v1715_v29  ;;  %v825_v23 = vld [vmem:[#allocation7 + $0x1a0] sm:$0xff]  ;;  %v826_v28 = vld [vmem:[#allocation7 + $0x1a8] sm:$0xff]  ;;  %v835_v17 = vld [vmem:[#allocation7 + $0x1f0] sm:$0xff] }
  0x53   :  { %v1564_v26 = vcombine.high %v821_v22, %v825_v23  ;;  %v813_v29 = vld [vmem:[#allocation7 + $0x140] sm:$0xff]  ;;  %v1563_v34 = vcombine.low %v821_v22, %v825_v23  ;;  %v1565_v35 = vcombine.low %v822_v27, %v826_v28  ;;  %v778_v12 = vld [vmem:[#allocation7 + $0x28] sm:$0xff]  ;;  %v1920_v22 = vmov 0  }
  0x54   :  { %1602 = vmatpush3.bf16.msra.mxu0 %v1716_v30  ;;  %v1566_v30 = vcombine.high %v822_v27, %v826_v28  ;;  %v805_v38 = vld [vmem:[#allocation7 + $0x100] sm:$0xff]  ;;  %v1577_v23 = vcombine.low %v832_v18, %v836_v21 }
  0x55   :  { %1624 = vmatpush3.bf16.msra.mxu1 %v1717_v31  ;;  %1631 = vmatprep.subr.bf16.mxu0 %v1718_v40  ;;  %v817_v31 = vld [vmem:[#allocation7 + $0x160] sm:$0xff]  ;;  %v806_v40 = vld [vmem:[#allocation7 + $0x108] sm:$0xff] }
  0x56   :  { %1653 = vmatprep.subr.bf16.mxu1 %v1719_v41  ;;  %v1556_v36 = vcombine.high %v813_v29, %v817_v31  ;;  %v810_v41 = vld [vmem:[#allocation7 + $0x128] sm:$0xff]  ;;  %v773_v8 = vld [vmem:[#allocation7] sm:$0xff] }
  0x57   :  { %644 = vmatmul.mubr.bf16.vlgmr.msra.gmra.mxu0 %v84_v37  ;;  %v1558_v37 = vcombine.high %v814_v32, %v818_v33  ;;  %v777_v9 = vld [vmem:[#allocation7 + $0x20] sm:$0xff] }
  0x58   :  { %684 = vmatmul.mubr.bf16.vlgmr.msra.gmra.mxu1 %v86_v39  ;;  %1632 = vmatpush3.bf16.msra.mxu0 %v1720_v42  ;;  %v809_v39 = vld [vmem:[#allocation7 + $0x120] sm:$0xff]  ;;  %v1555_v42 = vcombine.low %v813_v29, %v817_v31  ;;  %v1515_v13 = vcombine.low %v773_v8, %v777_v9 }
  0x59   :  { %1654 = vmatpush3.bf16.msra.mxu1 %v1721_v43  ;;  %1633 = vmatprep.subr.bf16.mxu0 %v1722_v44  ;;  %v1557_v43 = vcombine.low %v814_v32, %v818_v33  ;;  %v1548_v44 = vcombine.high %v805_v38, %v809_v39 }
  0x5a   :  { %1655 = vmatprep.subr.bf16.mxu1 %v1723_v45  ;;  %723 = vmatprep.mubr.bf16.mxu0 %v89_v10  ;;  %v1550_v45 = vcombine.high %v806_v40, %v810_v41  ;;  %v774_v10 = vld [vmem:[#allocation7 + $0x8] sm:$0xff] }
  0x5b   :  { %763 = vmatprep.mubr.bf16.mxu1 %v91_v11  ;;  %v1516_v11 = vcombine.high %v773_v8, %v777_v9  ;;  %v799_v9 = vld [vmem:[#allocation7 + $0xd0] sm:$0xff] }
  0x5c   :  { %1634 = vmatpush3.bf16.msra.mxu0 %v1724_v46  ;;  %v797_v46 = vld [vmem:[#allocation7 + $0xc0] sm:$0xff] }
  0x5d   :  { %1656 = vmatpush3.bf16.msra.mxu1 %v1725_v47  ;;  %1635 = vmatprep.subr.bf16.mxu0 %v1726_v48  ;;  %v801_v47 = vld [vmem:[#allocation7 + $0xe0] sm:$0xff]  ;;  %v798_v48 = vld [vmem:[#allocation7 + $0xc8] sm:$0xff] }
  0x5e   :  { %1657 = vmatprep.subr.bf16.mxu1 %v1727_v49  ;;  %v802_v49 = vld [vmem:[#allocation7 + $0xe8] sm:$0xff] }
  0x60   :  { %1636 = vmatpush3.bf16.msra.mxu0 %v1728_v50  ;;  %v1547_v50 = vcombine.low %v805_v38, %v809_v39 }
  0x61   :  { %1658 = vmatpush3.bf16.msra.mxu1 %v1729_v51  ;;  %1637 = vmatprep.subr.bf16.mxu0 %v1730_v52  ;;  %v1549_v51 = vcombine.low %v806_v40, %v810_v41  ;;  %v1540_v52 = vcombine.high %v797_v46, %v801_v47 }
  0x62   :  { %1659 = vmatprep.subr.bf16.mxu1 %v1731_v53  ;;  %v1542_v53 = vcombine.high %v798_v48, %v802_v49 }
  0x64   :  { %1638 = vmatpush3.bf16.msra.mxu0 %v1732_v54  ;;  %v789_v54 = vld [vmem:[#allocation7 + $0x80] sm:$0xff] }
  0x65   :  { %1660 = vmatpush3.bf16.msra.mxu1 %v1733_v55  ;;  %1639 = vmatprep.subr.bf16.mxu0 %v1734_v56  ;;  %v793_v55 = vld [vmem:[#allocation7 + $0xa0] sm:$0xff]  ;;  %v790_v56 = vld [vmem:[#allocation7 + $0x88] sm:$0xff] }
  0x66   :  { %1661 = vmatprep.subr.bf16.mxu1 %v1735_v57  ;;  %v794_v57 = vld [vmem:[#allocation7 + $0xa8] sm:$0xff] }
  0x68   :  { %1640 = vmatpush3.bf16.msra.mxu0 %v1736_v58  ;;  %v1539_v58 = vcombine.low %v797_v46, %v801_v47  ;;  %v823_v47 = vld [vmem:[#allocation7 + $0x190] sm:$0xff] }
  0x69   :  { %1662 = vmatpush3.bf16.msra.mxu1 %v1737_v59  ;;  %1641 = vmatprep.subr.bf16.mxu0 %v1738_v60  ;;  %v1541_v59 = vcombine.low %v798_v48, %v802_v49  ;;  %v1532_v60 = vcombine.high %v789_v54, %v793_v55  ;;  %v827_v49 = vld [vmem:[#allocation7 + $0x1b0] sm:$0xff] }
  0x6a   :  { %1663 = vmatprep.subr.bf16.mxu1 %v1739_v61  ;;  %v1534_v61 = vcombine.high %v790_v56, %v794_v57 }
  0x6c   :  { %1642 = vmatpush3.bf16.msra.mxu0 %v1740_v62  ;;  %v1531_v62 = vcombine.low %v789_v54, %v793_v55  ;;  %v1568_v55 = vcombine.high %v823_v47, %v827_v49 }
  0x6d   :  { %1664 = vmatpush3.bf16.msra.mxu1 %v1741_v63  ;;  %1643 = vmatprep.subr.bf16.mxu0 %v1742_v0  ;;  %v1533_v63 = vcombine.low %v790_v56, %v794_v57  ;;  %v781_v0 = vld [vmem:[#allocation7 + $0x40] sm:$0xff]  ;;  %v815_v57 = vld [vmem:[#allocation7 + $0x150] sm:$0xff] }
  0x6e   :  { %1665 = vmatprep.subr.bf16.mxu1 %v1743_v1  ;;  %v785_v1 = vld [vmem:[#allocation7 + $0x60] sm:$0xff] }
  0x70   :  { %1644 = vmatpush3.bf16.msra.mxu0 %v1744_v2  ;;  %v782_v2 = vld [vmem:[#allocation7 + $0x48] sm:$0xff] }
  0x71   :  { %1666 = vmatpush3.bf16.msra.mxu1 %v1745_v3  ;;  %1645 = vmatprep.subr.bf16.mxu0 %v1746_v4  ;;  %v1524_v3 = vcombine.high %v781_v0, %v785_v1  ;;  %v786_v4 = vld [vmem:[#allocation7 + $0x68] sm:$0xff] }
  0x72   :  { %1667 = vmatprep.subr.bf16.mxu1 %v1747_v5  ;;  %v1523_v5 = vcombine.low %v781_v0, %v785_v1  ;;  %v807_v1 = vld [vmem:[#allocation7 + $0x110] sm:$0xff] }
  0x74   :  { %1646 = vmatpush3.bf16.msra.mxu0 %v1748_v6  ;;  %v1525_v6 = vcombine.low %v782_v2, %v786_v4 }
  0x75   :  { %1668 = vmatpush3.bf16.msra.mxu1 %v1749_v7  ;;  %1199 = vmatprep.subr.bf16.mxu0 %v1572_v20  ;;  %v1526_v7 = vcombine.high %v782_v2, %v786_v4  ;;  %v1576_v20 = vcombine.high %v831_v16, %v835_v17  ;;  %v811_v2 = vld [vmem:[#allocation7 + $0x130] sm:$0xff]  ;;  %v812_v4 = vld [vmem:[#allocation7 + $0x138] sm:$0xff] }
  0x76   :  { %1240 = vmatprep.subr.bf16.mxu1 %v1574_v25 }
  0x77   :  { %724 = vmatmul.mubr.bf16.vlgmr.msra.gmra.mxu0 %v88_v14  ;;  %v1517_v14 = vcombine.low %v774_v10, %v778_v12 }
  0x78   :  { %764 = vmatmul.mubr.bf16.vlgmr.msra.gmra.mxu1 %v90_v15  ;;  %1200 = vmatpush1.bf16.msra.mxu0 %v1571_v19  ;;  %v1518_v15 = vcombine.high %v774_v10, %v778_v12  ;;  %v1575_v19 = vcombine.low %v831_v16, %v835_v17  ;;  %v803_v10 = vld [vmem:[#allocation7 + $0xf0] sm:$0xff]  ;;  %v804_v12 = vld [vmem:[#allocation7 + $0xf8] sm:$0xff] }
  0x79   :  { %1241 = vmatpush1.bf16.msra.mxu1 %v1573_v24  ;;  %1201 = vmatprep.subr.bf16.mxu0 %v1564_v26  ;;  %v1578_v24 = vcombine.high %v832_v18, %v836_v21  ;;  %v791_v17 = vld [vmem:[#allocation7 + $0x90] sm:$0xff]  ;;  %v1543_v21 = vcombine.low %v799_v9, %v803_v10 }
  0x7a   :  { %1242 = vmatprep.subr.bf16.mxu1 %v1566_v30  ;;  %1231 = vmatprep.mubr.bf16.mxu0 %v1920_v22  ;;  %v795_v18 = vld [vmem:[#allocation7 + $0xb0] sm:$0xff] }
  0x7b   :  { %1272 = vmatprep.mubr.bf16.mxu1 %v1920_v22 }
  0x7c   :  { %1202 = vmatpush1.bf16.msra.mxu0 %v1563_v34  ;;  %v1450_v34 = vld [vmem:[%s1987_s2] ss:$0 sm:$0xff]  ;;  %s1921_s2 = smov [#allocation10]  }
  0x7d   :  { %1243 = vmatpush1.bf16.msra.mxu1 %v1565_v35  ;;  %1203 = vmatprep.subr.bf16.mxu0 %v1556_v36  ;;  %s1425_s19 = sshll.u32 %s1921_s2, 4  ;;  %s1426_s19 = int_to_ptr.vmem [resolvable:$true] %s1425_s19 }
  0x7e   :  { %1244 = vmatprep.subr.bf16.mxu1 %v1558_v37  ;;  %s1862_s20 = scalar_lea.vmem %s1426_s19, 128  ;;  %p1867_p7 = scmp.lt.s32.totalorder %s1426_s19, %s1426_s19 }
  0x7f   :  { %p1863_p6 = scmp.ne.s32.totalorder %s1426_s19, %s1862_s20  ;;  %p1868_p8 = scmp.lt.s32.totalorder %s1862_s20, %s1862_s20 }
  0x80   :  { %1204 = vmatpush1.bf16.msra.mxu0 %v1555_v42 }
  0x81   :  { %1245 = vmatpush1.bf16.msra.mxu1 %v1557_v43  ;;  %1205 = vmatprep.subr.bf16.mxu0 %v1548_v44  ;;  %p1869_p9 = por %p1868_p8, %p1867_p7 }
  0x82   :  { %1246 = vmatprep.subr.bf16.mxu1 %v1550_v45 }
  0x83   :  { %p1870_p10 = pnand %p1869_p9, %p1863_p6 }
  0x84   :  { %1206 = vmatpush1.bf16.msra.mxu0 %v1547_v50  ;;  %v824_v50 = vld [vmem:[#allocation7 + $0x198] sm:$0xff] }
  0x85   :  { %1247 = vmatpush1.bf16.msra.mxu1 %v1549_v51  ;;  %1207 = vmatprep.subr.bf16.mxu0 %v1540_v52  ;;  %v828_v51 = vld [vmem:[#allocation7 + $0x1b8] sm:$0xff] }
  0x86   :  { %1248 = vmatprep.subr.bf16.mxu1 %v1542_v53  ;;  %v1570_v56 = vcombine.high %v824_v50, %v828_v51 }
  0x88   :  { %1208 = vmatpush1.bf16.msra.mxu0 %v1539_v58  ;;  %v819_v58 = vld [vmem:[#allocation7 + $0x170] sm:$0xff] }
  0x89   :  { %1249 = vmatpush1.bf16.msra.mxu1 %v1541_v59  ;;  %1209 = vmatprep.subr.bf16.mxu0 %v1532_v60  ;;  %v816_v59 = vld [vmem:[#allocation7 + $0x158] sm:$0xff] }
  0x8a   :  { %1250 = vmatprep.subr.bf16.mxu1 %v1534_v61  ;;  %v820_v60 = vld [vmem:[#allocation7 + $0x178] sm:$0xff]  ;;  %v1567_v61 = vcombine.low %v823_v47, %v827_v49 }
  0x8b   :  { %v1562_v0 = vcombine.high %v816_v59, %v820_v60 }
  0x8c   :  { %1210 = vmatpush1.bf16.msra.mxu0 %v1531_v62  ;;  %v1569_v62 = vcombine.low %v824_v50, %v828_v51 }
  0x8d   :  { %1251 = vmatpush1.bf16.msra.mxu1 %v1533_v63  ;;  %1211 = vmatprep.subr.bf16.mxu0 %v1524_v3  ;;  %v1560_v63 = vcombine.high %v815_v57, %v819_v58  ;;  %v808_v3 = vld [vmem:[#allocation7 + $0x118] sm:$0xff] }
  0x8e   :  { %1252 = vmatprep.subr.bf16.mxu1 %v1526_v7  ;;  %v1552_v7 = vcombine.high %v807_v1, %v811_v2  ;;  %v1554_v8 = vcombine.high %v808_v3, %v812_v4 }
  0x90   :  { %1212 = vmatpush1.bf16.msra.mxu0 %v1523_v5  ;;  %v1559_v5 = vcombine.low %v815_v57, %v819_v58 }
  0x91   :  { %1253 = vmatpush1.bf16.msra.mxu1 %v1525_v6  ;;  %1213 = vmatprep.subr.bf16.mxu0 %v1516_v11  ;;  %v1561_v6 = vcombine.low %v816_v59, %v820_v60  ;;  %v800_v11 = vld [vmem:[#allocation7 + $0xd8] sm:$0xff] }
  0x92   :  { %1254 = vmatprep.subr.bf16.mxu1 %v1518_v15  ;;  %v1544_v15 = vcombine.high %v799_v9, %v803_v10  ;;  %v1546_v16 = vcombine.high %v800_v11, %v804_v12 }
  0x94   :  { %1214 = vmatpush1.bf16.msra.mxu0 %v1515_v13  ;;  %v1551_v13 = vcombine.low %v807_v1, %v811_v2 }
  0x95   :  { %1255 = vmatpush1.bf16.msra.mxu1 %v1517_v14  ;;  %1281 = vmatprep.subr.bf16.mxu0 %v1576_v20  ;;  %v1553_v14 = vcombine.low %v808_v3, %v812_v4  ;;  %v796_v20 = vld [vmem:[#allocation7 + $0xb8] sm:$0xff] }
  0x96   :  { %1322 = vmatprep.subr.bf16.mxu1 %v1578_v24 }
 0x117   :  { %v1603_v25 = vpop.f32.mrf.mxu0 }
 0x118   :  { %v1625_v26 = vpop.f32.mrf.mxu1 }
 0x119   :  { %v1604_v27 = vpop.f32.mrf.mxu0 }
 0x11a   :  { %v1626_v28 = vpop.f32.mrf.mxu1  ;;  %v1605_v33 = vadd.f32 %v1604_v27, %v1603_v25  ;;  %v783_v25 = vld [vmem:[#allocation7 + $0x50] sm:$0xff]  ;;  %v784_v27 = vld [vmem:[#allocation7 + $0x58] sm:$0xff] }
 0x11b   :  { %v1606_v29 = vpop.f32.mrf.mxu0  ;;  %v1627_v36 = vadd.f32 %v1626_v28, %v1625_v26  ;;  %v787_v26 = vld [vmem:[#allocation7 + $0x70] sm:$0xff]  ;;  %v788_v28 = vld [vmem:[#allocation7 + $0x78] sm:$0xff] }
 0x11c   :  { %v1628_v30 = vpop.f32.mrf.mxu1  ;;  %v646_v35 = vadd.f32 %v1605_v33, %v1450_v34  ;;  %v1535_v29 = vcombine.low %v791_v17, %v795_v18  ;;  %v775_v33 = vld [vmem:[#allocation7 + $0x10] sm:$0xff] }
 0x11d   :  { %v1607_v31 = vpop.f32.mrf.mxu0  ;;  %v779_v34 = vld [vmem:[#allocation7 + $0x30] sm:$0xff] }
 0x11e   :  { %v1629_v32 = vpop.f32.mrf.mxu1  ;;  %v686_v40 = vadd.f32 %v1627_v36, %v646_v35  ;;  %v1528_v31 = vcombine.high %v783_v25, %v787_v26  ;;  %v776_v35 = vld [vmem:[#allocation7 + $0x18] sm:$0xff] }
 0x11f   :  { %v1530_v32 = vcombine.high %v784_v27, %v788_v28  ;;  %v780_v36 = vld [vmem:[#allocation7 + $0x38] sm:$0xff] }
 0x137   :  { %v1647_v37 = vpop.f32.mrf.mxu0 }
 0x138   :  { %v1669_v38 = vpop.f32.mrf.mxu1 }
 0x139   :  { %v1648_v39 = vpop.f32.mrf.mxu0 }
 0x13a   :  { %v1649_v41 = vadd.f32 %v1648_v39, %v1647_v37  ;;  %v1670_v42 = vpop.f32.mrf.mxu1  ;;  %v1527_v37 = vcombine.low %v783_v25, %v787_v26  ;;  %v1520_v39 = vcombine.high %v775_v33, %v779_v34 }
 0x13b   :  { %v1650_v43 = vpop.f32.mrf.mxu0  ;;  %v1671_v45 = vadd.f32 %v1670_v42, %v1669_v38  ;;  %v1529_v38 = vcombine.low %v784_v27, %v788_v28  ;;  %v1521_v42 = vcombine.low %v776_v35, %v780_v36 }
 0x13c   :  { %v726_v44 = vadd.f32 %v1649_v41, %v686_v40  ;;  %v1672_v46 = vpop.f32.mrf.mxu1  ;;  %v1522_v40 = vcombine.high %v776_v35, %v780_v36  ;;  %v1519_v41 = vcombine.low %v775_v33, %v779_v34 }
 0x13d   :  { %v1651_v48 = vpop.f32.mrf.mxu0 }
 0x13e   :  { %v766_v52 = vadd.f32 %v1671_v45, %v726_v44  ;;  %v1673_v53 = vpop.f32.mrf.mxu1 }
 0x140   :  { %v1973_v54 = vpack.c.bf16 %v766_v52, %v766_v52  ;;  %771 = vst [vmem:[#allocation10] sm:$0xff] %v766_v52 }
 0x142   :  { %1232 = vmatmul.mubr.bf16.vlgmr.msra.gmra.mxu0 %v1973_v54  ;;  %1273 = vmatmul.mubr.bf16.vlgmr.msra.gmra.mxu1 %v1973_v54 }
 0x143   :  { %1282 = vmatpush1.bf16.msra.mxu0 %v1575_v19  ;;  %1323 = vmatpush1.bf16.msra.mxu1 %v1577_v23  ;;  %v792_v19 = vld [vmem:[#allocation7 + $0x98] sm:$0xff]  ;;  %v1536_v23 = vcombine.high %v791_v17, %v795_v18 }
 0x144   :  { %1283 = vmatprep.subr.bf16.mxu0 %v1568_v55  ;;  %1324 = vmatprep.subr.bf16.mxu1 %v1570_v56  ;;  %v1538_v24 = vcombine.high %v792_v19, %v796_v20  ;;  %v1537_v30 = vcombine.low %v792_v19, %v796_v20 }
 0x145   :  { %1313 = vmatprep.mubr.bf16.mxu0 %v1920_v22  ;;  %1354 = vmatprep.mubr.bf16.mxu1 %v1920_v22  ;;  %v1545_v22 = vcombine.low %v800_v11, %v804_v12 }
 0x147   :  { %1284 = vmatpush1.bf16.msra.mxu0 %v1567_v61  ;;  %1325 = vmatpush1.bf16.msra.mxu1 %v1569_v62 }
 0x148   :  { %1285 = vmatprep.subr.bf16.mxu0 %v1560_v63  ;;  %1326 = vmatprep.subr.bf16.mxu1 %v1562_v0 }
 0x14b   :  { %1286 = vmatpush1.bf16.msra.mxu0 %v1559_v5  ;;  %1327 = vmatpush1.bf16.msra.mxu1 %v1561_v6 }
 0x14c   :  { %1287 = vmatprep.subr.bf16.mxu0 %v1552_v7  ;;  %1328 = vmatprep.subr.bf16.mxu1 %v1554_v8 }
 0x14f   :  { %1288 = vmatpush1.bf16.msra.mxu0 %v1551_v13  ;;  %1329 = vmatpush1.bf16.msra.mxu1 %v1553_v14 }
 0x150   :  { %1289 = vmatprep.subr.bf16.mxu0 %v1544_v15  ;;  %1330 = vmatprep.subr.bf16.mxu1 %v1546_v16 }
 0x153   :  { %1290 = vmatpush1.bf16.msra.mxu0 %v1543_v21  ;;  %1331 = vmatpush1.bf16.msra.mxu1 %v1545_v22 }
 0x154   :  { %1291 = vmatprep.subr.bf16.mxu0 %v1536_v23  ;;  %1332 = vmatprep.subr.bf16.mxu1 %v1538_v24 }
 0x157   :  { %1292 = vmatpush1.bf16.msra.mxu0 %v1535_v29  ;;  %1333 = vmatpush1.bf16.msra.mxu1 %v1537_v30 }
 0x158   :  { %1293 = vmatprep.subr.bf16.mxu0 %v1528_v31  ;;  %1334 = vmatprep.subr.bf16.mxu1 %v1530_v32 }
 0x15b   :  { %1294 = vmatpush1.bf16.msra.mxu0 %v1527_v37  ;;  %1335 = vmatpush1.bf16.msra.mxu1 %v1529_v38 }
 0x15c   :  { %1295 = vmatprep.subr.bf16.mxu0 %v1520_v39  ;;  %1336 = vmatprep.subr.bf16.mxu1 %v1522_v40 }
 0x15f   :  { %1296 = vmatpush1.bf16.msra.mxu0 %v1519_v41  ;;  %1337 = vmatpush1.bf16.msra.mxu1 %v1521_v42 }
 0x162   :  { %1314 = vmatmul.mubr.bf16.vlgmr.msra.gmra.mxu0 %v1973_v54  ;;  %1355 = vmatmul.mubr.bf16.vlgmr.msra.gmra.mxu1 %v1973_v54 }
 0x163   :  { %1873 = shalt.err (!%p1870_p10)
}
 0x164   :  { %1428 = dma.vmem_to_hbm [thread:$0]  %s1426_s19, 128, %s1990_s5, [#allocation4]   ;;  %v839_v43 = vlaneseq  ;;  %v837_v47 = vld [vmem:[#allocation8] sm:$0xff] }
 0x165   :  { %s1922_s5 = smov [#allocation11]  }
 0x166   :  { %v840_v44 = vshrl.u32 %v839_v43, 7  ;;  %s1435_s23 = sshll.u32 %s1922_s5, 4  ;;  %s1436_s23 = int_to_ptr.vmem [resolvable:$true] %s1435_s23 }
 0x167   :  { %s1882_s24 = scalar_lea.vmem %s1436_s23, 1024  ;;  %p1887_p12 = scmp.lt.s32.totalorder %s1436_s23, %s1436_s23 }
 0x168   :  { %v841_v45 = vsub.s32 0, %v840_v44  ;;  %v849_v46 = vsub.s32 2, %v840_v44  ;;  %v845_v48 = vsub.s32 1, %v840_v44  ;;  %v853_v49 = vsub.s32 3, %v840_v44  ;;  %p1883_p11 = scmp.ne.s32.totalorder %s1436_s23, %s1882_s24  ;;  %p1888_p13 = scmp.lt.s32.totalorder %s1882_s24, %s1882_s24 }
 0x169   :  { %v857_v14 = vsub.s32 4, %v840_v44  ;;  %v865_v15 = vsub.s32 6, %v840_v44  ;;  %v861_v16 = vsub.s32 5, %v840_v44  ;;  %v869_v17 = vsub.s32 7, %v840_v44 }
 0x16a   :  { %v842_v50 = vrot.slane %v837_v47, %v841_v45  ;;  %v850_v51 = vrot.slane %v837_v47, %v849_v46  ;;  %v846_v52 = vrot.slane %v837_v47, %v845_v48  ;;  %v854_v53 = vrot.slane %v837_v47, %v853_v49  ;;  %p1889_p0 = por %p1888_p13, %p1887_p12 }
 0x16b   :  { %v858_v18 = vrot.slane %v837_v47, %v857_v14  ;;  %v866_v19 = vrot.slane %v837_v47, %v865_v15  ;;  %v862_v20 = vrot.slane %v837_v47, %v861_v16  ;;  %v870_v21 = vrot.slane %v837_v47, %v869_v17 }
 0x16c   :  { %p1890_p1 = pnand %p1889_p0, %p1883_p11 }
 0x202   :  { %v1233_v54 = vpop.f32.mrf.mxu0  ;;  %v1274_v55 = vpop.f32.mrf.mxu1 }
 0x203   :  { %v1234_v56 = vadd.f32 %v1233_v54, %v842_v50  ;;  %v1275_v57 = vadd.f32 %v1274_v55, %v850_v51 }
 0x204   :  { %v1235_v58 = vpop.f32.mrf.mxu0  ;;  %v1276_v59 = vpop.f32.mrf.mxu1 }
 0x205   :  { %v1579_v60 = vmul.f32 -1.442695, %v1234_v56  ;;  %v1581_v61 = vmul.f32 -1.442695, %v1275_v57  ;;  %v1236_v62 = vadd.f32 %v1235_v58, %v846_v52  ;;  %v1277_v63 = vadd.f32 %v1276_v59, %v854_v53 }
 0x206   :  { %v1237_v0 = vpop.f32.mrf.mxu0  ;;  %v1278_v1 = vpop.f32.mrf.mxu1 }
 0x207   :  { %1750 = vpow2.f32 %v1579_v60  ;;  %v1580_v2 = vmul.f32 -1.442695, %v1236_v62  ;;  %v1582_v3 = vmul.f32 -1.442695, %v1277_v63 }
 0x208   :  { %1752 = vpow2.f32 %v1581_v61  ;;  %v1238_v4 = vpop.f32.mrf.mxu0  ;;  %v1279_v5 = vpop.f32.mrf.mxu1 }
 0x209   :  { %1754 = vpow2.f32 %v1580_v2 }
 0x20a   :  { %1756 = vpow2.f32 %v1582_v3 }
 0x214   :  { %v1751_v6 = vpop.eup %1750 }
 0x215   :  { %v1753_v7 = vpop.eup %1752  ;;  %v1387_v8 = vadd.f32 1.0, %v1751_v6 }
 0x216   :  { %v1755_v9 = vpop.eup %1754  ;;  %v1389_v10 = vadd.f32 1.0, %v1753_v7 }
 0x217   :  { %v1757_v11 = vpop.eup %1756  ;;  %1758 = vrcp.f32 %v1387_v8  ;;  %v1388_v12 = vadd.f32 1.0, %v1755_v9 }
 0x218   :  { %1760 = vrcp.f32 %v1389_v10  ;;  %v1390_v13 = vadd.f32 1.0, %v1757_v11 }
 0x219   :  { %1762 = vrcp.f32 %v1388_v12 }
 0x21a   :  { %1764 = vrcp.f32 %v1390_v13 }
 0x222   :  { %v1315_v22 = vpop.f32.mrf.mxu0  ;;  %v1356_v23 = vpop.f32.mrf.mxu1 }
 0x223   :  { %v1316_v24 = vadd.f32 %v1315_v22, %v858_v18  ;;  %v1357_v25 = vadd.f32 %v1356_v23, %v866_v19 }
 0x224   :  { %v1759_v26 = vpop.eup %1758  ;;  %v1317_v27 = vpop.f32.mrf.mxu0 }
 0x225   :  { %v1358_v28 = vpop.f32.mrf.mxu1  ;;  %v1761_v29 = vpop.eup %1760  ;;  %1411 = vst [vmem:[#allocation11] sm:$0xff] %v1759_v26  ;;  %v1583_v30 = vmul.f32 -1.442695, %v1316_v24  ;;  %v1585_v31 = vmul.f32 -1.442695, %v1357_v25  ;;  %v1318_v32 = vadd.f32 %v1317_v27, %v862_v20 }
 0x226   :  { %v1359_v33 = vadd.f32 %v1358_v28, %v870_v21  ;;  %v1763_v34 = vpop.eup %1762  ;;  %1413 = vst [vmem:[#allocation11 + $0x10] sm:$0xff] %v1761_v29  ;;  %v1319_v35 = vpop.f32.mrf.mxu0 }
 0x227   :  { %v1360_v36 = vpop.f32.mrf.mxu1  ;;  %v1765_v37 = vpop.eup %1764  ;;  %1412 = vst [vmem:[#allocation11 + $0x8] sm:$0xff] %v1763_v34  ;;  %1766 = vpow2.f32 %v1583_v30  ;;  %v1584_v38 = vmul.f32 -1.442695, %v1318_v32 }
 0x228   :  { %v1586_v39 = vmul.f32 -1.442695, %v1359_v33  ;;  %1414 = vst [vmem:[#allocation11 + $0x18] sm:$0xff] %v1765_v37  ;;  %1768 = vpow2.f32 %v1585_v31  ;;  %v1320_v40 = vpop.f32.mrf.mxu0 }
 0x229   :  { %v1361_v41 = vpop.f32.mrf.mxu1  ;;  %1770 = vpow2.f32 %v1584_v38 }
 0x22a   :  { %1772 = vpow2.f32 %v1586_v39 }
 0x234   :  { %v1767_v42 = vpop.eup %1766 }
 0x235   :  { %v1769_v43 = vpop.eup %1768  ;;  %v1391_v44 = vadd.f32 1.0, %v1767_v42 }
 0x236   :  { %v1771_v45 = vpop.eup %1770  ;;  %v1393_v46 = vadd.f32 1.0, %v1769_v43 }
 0x237   :  { %v1773_v47 = vpop.eup %1772  ;;  %1774 = vrcp.f32 %v1391_v44  ;;  %v1392_v48 = vadd.f32 1.0, %v1771_v45 }
 0x238   :  { %1776 = vrcp.f32 %v1393_v46  ;;  %v1394_v49 = vadd.f32 1.0, %v1773_v47 }
 0x239   :  { %1778 = vrcp.f32 %v1392_v48 }
 0x23a   :  { %1780 = vrcp.f32 %v1394_v49 }
 0x244   :  { %v1775_v50 = vpop.eup %1774 }
 0x245   :  { %v1777_v51 = vpop.eup %1776  ;;  %1415 = vst [vmem:[#allocation11 + $0x20] sm:$0xff] %v1775_v50 }
 0x246   :  { %v1779_v52 = vpop.eup %1778  ;;  %1417 = vst [vmem:[#allocation11 + $0x30] sm:$0xff] %v1777_v51 }
 0x247   :  { %v1781_v53 = vpop.eup %1780  ;;  %1416 = vst [vmem:[#allocation11 + $0x28] sm:$0xff] %v1779_v52 }
 0x248   :  { %1418 = vst [vmem:[#allocation11 + $0x38] sm:$0xff] %v1781_v53 }
 0x249   :  { %1893 = shalt.err (!%p1890_p1)
}
 0x24a   :  { %1438 = dma.vmem_to_hbm [thread:$0]  %s1436_s23, 1024, %s1991_s6, [#allocation12]  }
 0x24b   :  { %1908 = dma.done.wait [#allocation4], 128  }
 0x24c   :  { %1909 = vsyncadd [#allocation4], 4294967168 }
 0x24d   :  { %1910 = dma.done.wait [#allocation12], 1024  }
 0x24e   :  { %1911 = vsyncadd [#allocation12], 4294966272 }
 0x24f   :  { %1445 = vsyncpa [#allocation3], 1 }
 0x250   :  { %1446 = vsyncpa [#allocation6], 1 }
 0x251   :  { %1447 = vsyncpa [#allocation9], 1 }
 0x252   :  { %1448 = vsyncpa [#allocation4], 1 }
 0x253   :  { %1449 = vsyncpa [#allocation12], 1 }

</bundles_post_ra>
